<compile_context>
chip_gen: v5e
topology: v5e:2x2
jax: 0.10.0
libtpu: 0.0.40
codegen_flags: <defaults>
</compile_context>

<pallas_src>
import math
import functools

import jax
import jax.numpy as jnp
from jax.experimental import pallas as pl
from jax.experimental.pallas import tpu as pltpu


def _round_up(x: int, m: int) -> int:
    return ((x + m - 1) // m) * m


def _cdiv(a: int, b: int) -> int:
    return (a + b - 1) // b


# Sublane packing minimum per element size (f32 -> 8, bf16 -> 16, int8/fp8 -> 32).
_SUBLANE_MIN = {4: 8, 2: 16, 1: 32}

_TRANSCENDENTAL_ACTS = ("tanh", "sigmoid", "gelu")


def _apply_activation(y, activation: str):
    if activation == "relu":
        return jnp.maximum(y, 0.0)
    if activation == "tanh":
        return jnp.tanh(y)
    if activation == "sigmoid":
        return jax.nn.sigmoid(y)
    if activation == "gelu":
        return jax.nn.gelu(y)
    # Unknown / "identity": no-op (the PyTorch module sets self.activation = None).
    return y


def _largest_dividing_tile(dim: int, max_tile: int, granule: int = 128) -> int:
    """Largest multiple of `granule` that divides `dim` and is <= max(max_tile, granule).
    `dim` must itself be a multiple of `granule`."""
    best = granule
    t = granule
    cap = max(max_tile, granule)
    while t <= min(cap, dim):
        if dim % t == 0:
            best = t
        t += granule
    return best


# ---------------------------------------------------------------------------
# Pallas kernels
# ---------------------------------------------------------------------------
def _dense_kernel_single_k(*refs, activation: str, use_bias: bool):
    """Whole K in one tile: dot + bias + activation straight to o_ref."""
    if use_bias:
        x_ref, w_ref, b_ref, o_ref = refs
    else:
        x_ref, w_ref, o_ref = refs
        b_ref = None
    y = jnp.dot(x_ref[...], w_ref[...], preferred_element_type=jnp.float32)
    if use_bias:
        y = y + b_ref[...].astype(jnp.float32)
    o_ref[...] = _apply_activation(y, activation).astype(o_ref.dtype)


def _dense_kernel_multi_k(*refs, activation: str, use_bias: bool):
    """Multi-step K reduction with f32 VMEM accumulator and fused epilogue."""
    if use_bias:
        x_ref, w_ref, b_ref, o_ref, acc_ref = refs
    else:
        x_ref, w_ref, o_ref, acc_ref = refs
        b_ref = None

    k = pl.program_id(2)

    @pl.when(k == 0)
    def _():
        acc_ref[...] = jnp.zeros_like(acc_ref)

    acc_ref[...] += jnp.dot(
        x_ref[...], w_ref[...], preferred_element_type=jnp.float32
    )

    @pl.when(k == pl.num_programs(2) - 1)
    def _():
        y = acc_ref[...]
        if use_bias:
            y = y + b_ref[...].astype(jnp.float32)
        o_ref[...] = _apply_activation(y, activation).astype(o_ref.dtype)


# ---------------------------------------------------------------------------
# One-time parameter preparation (hoisted out of the per-call path)
# ---------------------------------------------------------------------------
def prepare_dense_params(weight, bias=None):
    """Transpose W [out,in] -> [K, N] and zero-pad K to a multiple of 128.

    Do this ONCE per weight (e.g. at init); the forward pass then never touches
    the weight outside the Pallas pipeline. Zero-padding K is required so the
    reduction never multiplies unspecified out-of-bounds data into real outputs.
    """
    out_features, in_features = weight.shape
    kp = _round_up(in_features, 128)
    w_kn = weight.T
    if kp != in_features:
        w_kn = jnp.pad(w_kn, ((0, kp - in_features), (0, 0)))
    b_1n = None if bias is None else bias.reshape(1, out_features)
    return w_kn, b_1n


# ---------------------------------------------------------------------------
# Forward pass (prepared-weight fast path)
# ---------------------------------------------------------------------------
def dense_forward_prepared(x, w_kn, bias_1n=None, activation: str = "identity",
                           *, tm_max: int = 512, tn_max: int = 512,
                           tk_max: int = 1024,
                           vmem_budget_bytes: int = 26 * 1024 * 1024):
    """x: [..., in_features]; w_kn: [Kp, out_features] (from prepare_dense_params)."""
    kp, n = w_kn.shape
    in_features = x.shape[-1]
    assert kp == _round_up(in_features, 128), "weight not prepared for this in_features"

    orig_shape = x.shape
    x2d = x.reshape((-1, in_features))
    m = x2d.shape[0]

    # Only the K axis needs explicit zero-padding of x (and only when ragged).
    if kp != in_features:
        x2d = jnp.pad(x2d, ((0, 0), (0, kp - in_features)))

    x_is = jnp.dtype(x2d.dtype).itemsize
    w_is = jnp.dtype(w_kn.dtype).itemsize
    o_is = jnp.dtype(x.dtype).itemsize
    b_is = jnp.dtype(bias_1n.dtype).itemsize if bias_1n is not None else 0
    use_bias = bias_1n is not None

    # ---- tile selection ---------------------------------------------------
    sub = _SUBLANE_MIN.get(x_is, 8)
    tm = min(_round_up(tm_max, sub), _round_up(m, sub))
    if n < 128:
        tn = n                       # full-dim lane block for tiny N
    else:
        tn = min(_round_up(tn_max, 128), _round_up(n, 128))
    tk = _largest_dividing_tile(kp, tk_max)

    def vmem_est(tm_, tn_, tk_, multi_k_):
        est = 2 * (tm_ * tk_ * x_is + tk_ * tn_ * w_is + tm_ * tn_ * o_is)
        if use_bias:
            est += 2 * tn_ * b_is
        if multi_k_:
            est += 4 * tm_ * tn_     # f32 accumulator scratch
        return est

    # Keep the double-buffered working set within a conservative budget
    # (safe even on v7x's 64 MiB physical / 32 MiB scoped VMEM per TC).
    while vmem_est(tm, tn, tk, kp > tk) > vmem_budget_bytes:
        if tk > 128:
            tk = _largest_dividing_tile(kp, tk // 2)
        elif tn > 128:
            tn = max(128, _round_up(tn // 2, 128))
        elif tm > sub:
            tm = max(sub, _round_up(tm // 2, sub))
        else:
            break

    grid_m, grid_n = _cdiv(m, tm), _cdiv(n, tn)
    # v7x has 2 TensorCores: make sure at least one "parallel" axis has >=2 blocks.
    if grid_m == 1 and grid_n == 1:
        if tn > 128:
            tn = _round_up(_cdiv(tn, 2), 128)
        elif tm > sub:
            tm = _round_up(_cdiv(tm, 2), sub)
        grid_m, grid_n = _cdiv(m, tm), _cdiv(n, tn)

    nk = kp // tk
    multi_k = nk > 1

    # ---- specs / kernel selection ------------------------------------------
    operands = [x2d, w_kn]
    if multi_k:
        in_specs = [
            pl.BlockSpec((tm, tk), lambda i, j, kk: (i, kk)),
            pl.BlockSpec((tk, tn), lambda i, j, kk: (kk, j)),
        ]
        if use_bias:
            operands.append(bias_1n)
            in_specs.append(pl.BlockSpec((1, tn), lambda i, j, kk: (0, j)))
        out_spec = pl.BlockSpec((tm, tn), lambda i, j, kk: (i, j))
        scratch = [pltpu.VMEM((tm, tn), jnp.float32)]
        kernel = functools.partial(
            _dense_kernel_multi_k, activation=activation, use_bias=use_bias)
        grid = (grid_m, grid_n, nk)
        semantics = ("parallel", "parallel", "arbitrary")
    else:
        in_specs = [
            pl.BlockSpec((tm, tk), lambda i, j: (i, 0)),
            pl.BlockSpec((tk, tn), lambda i, j: (0, j)),
        ]
        if use_bias:
            operands.append(bias_1n)
            in_specs.append(pl.BlockSpec((1, tn), lambda i, j: (0, j)))
        out_spec = pl.BlockSpec((tm, tn), lambda i, j: (i, j))
        scratch = []
        kernel = functools.partial(
            _dense_kernel_single_k, activation=activation, use_bias=use_bias)
        grid = (grid_m, grid_n)
        semantics = ("parallel", "parallel")

    # ---- cost estimate (count tiling re-reads) -----------------------------
    cost = pl.CostEstimate(
        flops=2 * m * n * kp,
        transcendentals=(m * n if activation in _TRANSCENDENTAL_ACTS else 0),
        bytes_accessed=(x2d.size * x_is) * grid_n
        + (w_kn.size * w_is) * grid_m
        + (n * b_is) * grid_m
        + m * n * o_is,
    )

    est = vmem_est(tm, tn, tk, multi_k)
    # Raise the scoped-VMEM limit (v5e default is only 16 MiB); cap well under
    # v7x's 64 MiB physical VMEM.
    vmem_limit = int(min(max(32 * 1024 * 1024, est * 3 // 2), 48 * 1024 * 1024))

    y2d = pl.pallas_call(
        kernel,
        out_shape=jax.ShapeDtypeStruct((m, n), x.dtype),
        grid_spec=pltpu.PrefetchScalarGridSpec(
            num_scalar_prefetch=0,
            grid=grid,
            in_specs=in_specs,
            out_specs=out_spec,
            scratch_shapes=scratch,
        ),
        compiler_params=pltpu.CompilerParams(
            dimension_semantics=semantics,
            vmem_limit_bytes=vmem_limit,
        ),
        cost_estimate=cost,
    )(*operands)

    if len(orig_shape) > 2:
        y2d = y2d.reshape(orig_shape[:-1] + (n,))
    elif len(orig_shape) == 1:
        y2d = y2d.reshape((n,))
    return y2d


def dense_forward(x, weight, bias=None, activation: str = "identity", **kwargs):
    """Convenience wrapper: prepares the weight per call. For repeated use,
    call prepare_dense_params() once and dense_forward_prepared() per step."""
    w_kn, b_1n = prepare_dense_params(weight, bias)
    return dense_forward_prepared(x, w_kn, b_1n, activation, **kwargs)


# ---------------------------------------------------------------------------
# Deterministic parameter init (mirrors Dense.reset_parameters)
# ---------------------------------------------------------------------------
def init_dense_params(key, in_features, out_features, use_bias=True,
                      dtype=jnp.float32):
    kw, kb = jax.random.split(key)
    # kaiming_uniform_(a=sqrt(5)) on [out, in] -> U(-1/sqrt(fan_in), 1/sqrt(fan_in))
    bound = 1.0 / math.sqrt(in_features)
    weight = jax.random.uniform(
        kw, (out_features, in_features), dtype, minval=-bound, maxval=bound)
    bias = None
    if use_bias:
        bias = jax.random.uniform(
            kb, (out_features,), dtype, minval=-bound, maxval=bound)
    return weight, bias


if __name__ == "__main__":
    key = jax.random.PRNGKey(0)
    k_x1, k_p1, k_x2, k_p2, k_x3, k_p3 = jax.random.split(key, 6)
    hi = jax.lax.Precision.HIGHEST

    # 1) Small module-like shape: batch=2, seq=8, hidden=32, tanh + bias.
    #    Uses the prepared-weight fast path (transpose/pad hoisted to init).
    batch, seq, in_f, out_f = 2, 8, 32, 32
    x1 = jax.random.normal(k_x1, (batch, seq, in_f), jnp.float32)
    w1, b1 = init_dense_params(k_p1, in_f, out_f, use_bias=True)
    w1_kn, b1_1n = prepare_dense_params(w1, b1)
    y1 = jax.block_until_ready(dense_forward_prepared(x1, w1_kn, b1_1n, "tanh"))
    y1_ref = jnp.tanh(
        jnp.dot(x1.reshape(-1, in_f), w1.T, precision=hi) + b1
    ).reshape(batch, seq, out_f)
    assert y1.shape == (batch, seq, out_f)
    assert jnp.allclose(y1, y1_ref, atol=1e-4, rtol=1e-4)

    # 2) Ragged M, single-K-step path, no bias, relu (no M/N padding, masked
    #    partial output blocks, convenience wrapper).
    m2, k2, n2 = 200, 640, 384
    x2 = jax.random.normal(k_x2, (m2, k2), jnp.float32)
    w2, _ = init_dense_params(k_p2, k2, n2, use_bias=False)
    y2 = jax.block_until_ready(dense_forward(x2, w2, None, "relu"))
    y2_ref = jnp.maximum(jnp.dot(x2, w2.T, precision=hi), 0.0)
    assert y2.shape == (m2, n2)
    assert jnp.allclose(y2, y2_ref, atol=1e-3, rtol=1e-4)

    # 3) Larger K exercising the multi-step-K accumulator path with bias + sigmoid.
    m3, k3, n3 = 200, 2048, 384
    x3 = jax.random.normal(k_x3, (m3, k3), jnp.float32)
    w3, b3 = init_dense_params(k_p3, k3, n3, use_bias=True)
    w3_kn, b3_1n = prepare_dense_params(w3, b3)
    y3 = jax.block_until_ready(dense_forward_prepared(x3, w3_kn, b3_1n, "sigmoid"))
    y3_ref = jax.nn.sigmoid(jnp.dot(x3, w3.T, precision=hi) + b3)
    assert y3.shape == (m3, n3)
    assert jnp.allclose(y3, y3_ref, atol=1e-3, rtol=1e-3)

    print("KERNEL_OK")
</pallas_src>

<mosaic_0001>
module attributes {stable_mosaic.version = 11 : i64} {
  func.func @_dense_kernel_single_k(%arg0: i32, %arg1: i32, %arg2: memref<8x128xf32, #tpu.memory_space<vmem>>, %arg3: memref<128x32xf32, #tpu.memory_space<vmem>>, %arg4: memref<1x32xf32, #tpu.memory_space<vmem>>, %arg5: memref<8x32xf32, #tpu.memory_space<vmem>>) attributes {dimension_semantics = [#tpu.dimension_semantics<parallel>, #tpu.dimension_semantics<parallel>], iteration_bounds = array<i64: 2, 1>, scalar_prefetch = 0 : i64, scratch_operands = 0 : i64, tpu.core_type = #tpu.core_type<tc>, window_params = [{transform_indices = @transform_0, window_bounds = array<i64: 8, 128>}, {transform_indices = @transform_1, window_bounds = array<i64: 128, 32>}, {transform_indices = @transform_2, window_bounds = array<i64: 1, 32>}, {transform_indices = @transform_3, window_bounds = array<i64: 8, 32>}]} {
    %c0 = arith.constant 0 : index
    %c0_0 = arith.constant 0 : index
    %0 = vector.load %arg2[%c0, %c0_0] : memref<8x128xf32, #tpu.memory_space<vmem>>, vector<8x128xf32>
    %c0_1 = arith.constant 0 : index
    %c0_2 = arith.constant 0 : index
    %1 = vector.load %arg3[%c0_1, %c0_2] : memref<128x32xf32, #tpu.memory_space<vmem>>, vector<128x32xf32>
    %cst = arith.constant dense<0.000000e+00> : vector<8x32xf32>
    %2 = tpu.matmul %0, %1, %cst {dimension_numbers = #tpu.dot_dimension_numbers<[1], [0], [0], [1], [0, 0, 1, 1], [], []>} : vector<8x128xf32>, vector<128x32xf32>, vector<8x32xf32> -> vector<8x32xf32>
    %c0_3 = arith.constant 0 : index
    %c0_4 = arith.constant 0 : index
    %3 = vector.load %arg4[%c0_3, %c0_4] : memref<1x32xf32, #tpu.memory_space<vmem>>, vector<1x32xf32>
    %4 = vector.broadcast %3 : vector<1x32xf32> to vector<8x32xf32>
    %5 = arith.addf %2, %4 : vector<8x32xf32>
    %6 = math.tanh %5 : vector<8x32xf32>
    %c0_5 = arith.constant 0 : index
    %c0_6 = arith.constant 0 : index
    %7 = vector.load %arg5[%c0_5, %c0_6] : memref<8x32xf32, #tpu.memory_space<vmem>>, vector<8x32xf32>
    tpu.vector_store %arg5[%c0_5, %c0_6], %6 {strides = array<i32>} : memref<8x32xf32, #tpu.memory_space<vmem>>, vector<8x32xf32>,
    return
  }
  func.func @transform_0(%arg0: i32, %arg1: i32) -> (i32, i32) {
    %c0_i32 = arith.constant 0 : i32
    %c0_i32_0 = arith.constant 0 : i32
    return %arg0, %c0_i32 : i32, i32
  }
  func.func @transform_1(%arg0: i32, %arg1: i32) -> (i32, i32) {
    %c0_i32 = arith.constant 0 : i32
    %c0_i32_0 = arith.constant 0 : i32
    return %c0_i32, %arg1 : i32, i32
  }
  func.func @transform_2(%arg0: i32, %arg1: i32) -> (i32, i32) {
    %c0_i32 = arith.constant 0 : i32
    %c0_i32_0 = arith.constant 0 : i32
    return %c0_i32, %arg1 : i32, i32
  }
  func.func @transform_3(%arg0: i32, %arg1: i32) -> (i32, i32) {
    %c0_i32 = arith.constant 0 : i32
    return %arg0, %arg1 : i32, i32
  }
}

</mosaic_0001>

<bundles_post_ra>
// kernel: tpu_custom_call.1
= control target key start
LH: loop header
LB: loop body
LE: loop exit
PB: predicated region body
PF: predicated region fallthrough
CT: control target
= control target key end

     0   :  { %8 = vsyncpa [#allocation3], 0  ;;  %s686_s0 = inlined_call_operand.vmem [shape: f32[16,128], index: 0, kind: input, shape index: {}]   ;;  %s687_s1 = inlined_call_operand.vmem [shape: f32[128,32], index: 1, kind: input, shape index: {}]   ;;  %s688_s2 = inlined_call_operand.vmem [shape: f32[1,32], index: 2, kind: input, shape index: {}]   ;;  %s689_s3 = inlined_call_operand.hbm [shape: f32[16,32], index: 3, kind: output, shape index: {}]  }
   0x1   :  { %10 = vsyncpa [#allocation3 + $0x1], 0  ;;  %s538_s12 = smov 0   ;;  %s540_s13 = smov 0  }
   0x2   :  { %s542_s14 = smov 0   ;;  %s544_s15 = smov 0  }
   0x3   :  { %s546_s16 = smov 0   ;;  %s548_s17 = smov 0  }
   0x4 LB: > { %s367_s18 = sadd.s32 4294967295, %s516_s17   ;;  %s368_s19 = sadd.s32 4294967294, %s516_s17   ;;  %s516_s17 = sphi %s548_s17, %s16_s17   ;;  %s512_s16 = sphi %s546_s16, %s696_s16   ;;  %s508_s15 = sphi %s544_s15, %s695_s15   ;;  %s504_s14 = sphi %s542_s14, %s694_s14   ;;  %s500_s13 = sphi %s540_s13, %s693_s13   ;;  %s496_s12 = sphi %s538_s12, %s692_s12  }
   0x5   : > { %s28_s20 = sadd.s32 1, %s512_s16  ;;  %s115_s21 = sadd.s32 1, %s504_s14 }
   0x6   : > { %p30_p0 = scmp.ge.s32.totalorder %s28_s20, 2  ;;  %p125_p1 = scmp.ne.s32.totalorder %s504_s14, %s500_s13 }
   0x7   : > { %p126_p2 = scmp.eq.s32.totalorder %s367_s18, 1  ;;  %p131_p3 = scmp.ne.s32.totalorder %s500_s13, %s496_s12 }
   0x8   : > { %s698_s20 = smov (%p30_p0, %s28_s20), 0  ;;  %p132_p5 = scmp.eq.s32.totalorder %s368_s19, 1 }
   0x9   : > { %p578_p4 = por %p126_p2, %p125_p1  ;;  %s110_s23 = ssub.s32 %s512_s16, %s698_s20 }
   0xa   : > { %p373_p6 = scmp.ge.s32.totalorder %s516_s17, 1  ;;  %p113_p7 = scmp.eq.s32.totalorder %s110_s23, 0 }
   0xb   : > { %p585_p8 = por %p132_p5, %p131_p3  ;;  %p170_p9 = scmp.lt.s32.totalorder %s516_s17, 3 }
   0xc   : > { %s591_s25 = scalar_select %p113_p7, %s504_s14, %s115_s21  }
   0xd   : > { %p171_p10 = pnand %p373_p6, %p170_p9 }
   0xe   : > { %p200_p11 = scmp.lt.s32.totalorder (!%p171_p10), %s508_s15, 1  ;;  %s197_s29 = sand.u32 (!%p171_p10), 1, %s500_s13  }
   0xf   : > { %174 = sbr.rel (%p171_p10) target bundleno = 190 (0xbe), region = 32  ;;  %s374_s5 = sshll.u32 (!%p171_p10), %s197_s29, 3 }
  0x10   : > { %s377_s6 = sshll.u32 (!%p171_p10), %s508_s15, 3  ;;  %s199_s10 = scalar_lea.vmem (!%p171_p10), [#allocation2], %s374_s5 }
  0x11   : > { %s269_s11 = sshll.u32 (!%p171_p10), %s199_s10, 4  ;;  %s256_s19 = scalar_lea.sflag (!%p171_p10), [#allocation3], %s197_s29  ;;  %s270_s11 = int_to_ptr.vmem [resolvable:$true] %s269_s11 }
  0x12   : > { %s458_s27 = scalar_lea.hbm (!%p171_p10), %s689_s3, 16 }
  0x14   : > { %v227_v0 = vld [vmem:[%s687_s1 + $0x78] sm:$0xff]  ;;  %v226_v1 = vld [vmem:[%s687_s1 + $0x70] sm:$0xff]  ;;  %v225_v2 = vld [vmem:[%s687_s1 + $0x68] sm:$0xff]  ;;  %s201_s4 = scalar_select %p200_p11, %s508_s15, 1  ;;  %vm253_vm0 = vcmask 261120  }
  0x15   : > { %232 = vmatpush.msra.mxu0 %v227_v0  ;;  %v224_v3 = vld [vmem:[%s687_s1 + $0x60] sm:$0xff]  ;;  %v223_v4 = vld [vmem:[%s687_s1 + $0x58] sm:$0xff]  ;;  %v222_v5 = vld [vmem:[%s687_s1 + $0x50] sm:$0xff] }
  0x16   : > { %v221_v6 = vld [vmem:[%s687_s1 + $0x48] sm:$0xff]  ;;  %v220_v7 = vld [vmem:[%s687_s1 + $0x40] sm:$0xff]  ;;  %v219_v8 = vld [vmem:[%s687_s1 + $0x38] sm:$0xff]  ;;  %s375_s9 = sshll.u32 %s201_s4, 3 }
  0x17   : > { %233 = vmatpush.msra.mxu0 %v226_v1  ;;  %v218_v9 = vld [vmem:[%s687_s1 + $0x30] sm:$0xff]  ;;  %v217_v10 = vld [vmem:[%s687_s1 + $0x28] sm:$0xff]  ;;  %v216_v11 = vld [vmem:[%s687_s1 + $0x20] sm:$0xff]  ;;  %s203_s26 = scalar_lea.vmem %s686_s0, %s375_s9  ;;  %s267_s9 = scalar_lea.hbm %s689_s3, %s377_s6 }
  0x18   : > { %v215_v12 = vld [vmem:[%s687_s1 + $0x18] sm:$0xff]  ;;  %v214_v13 = vld [vmem:[%s687_s1 + $0x10] sm:$0xff]  ;;  %v213_v14 = vld [vmem:[%s687_s1 + $0x8] sm:$0xff]  ;;  %s271_s18 = sshll.u32 %s267_s9, 4  ;;  %s272_s18 = int_to_ptr.hbm [resolvable:$true] %s271_s18 }
  0x19   : > { %234 = vmatpush.msra.mxu0 %v225_v2  ;;  %v212_v15 = vld [vmem:[%s687_s1] sm:$0xff]  ;;  %s452_s21 = sshra.s32 %s272_s18, 4  ;;  %s453_s21 = int_to_ptr.hbm [resolvable:$true] %s452_s21 }
  0x1a   : > { %v211_v16 = vld [vmem:[%s203_s26] sm:$0xff]  ;;  %s454_s15 = scalar_lea.hbm %s453_s21, 8  ;;  %p459_p1 = scmp.lt.s32.totalorder %s453_s21, %s689_s3 }
  0x1b   : > { %235 = vmatpush.msra.mxu0 %v224_v3  ;;  %v435_v17 = vld [vmem:[%s688_s2] ss:$0 sm:$0xff]  ;;  %p455_p12 = scmp.ne.s32.totalorder %s453_s21, %s454_s15  ;;  %p460_p2 = scmp.lt.s32.totalorder %s458_s27, %s454_s15 }
  0x1d   : > { %236 = vmatpush.msra.mxu0 %v223_v4  ;;  %p456_p13 = pnand %p455_p12, %p578_p4  ;;  %p461_p3 = por %p460_p2, %p459_p1 }
  0x1f   : > { %237 = vmatpush.msra.mxu0 %v222_v5  ;;  %p457_p0 = pneg %p456_p13 }
  0x21   : > { %238 = vmatpush.msra.mxu0 %v221_v6  ;;  %p462_p5 = pnand %p461_p3, %p457_p0 }
  0x23   : > { %239 = vmatpush.msra.mxu0 %v220_v7 }
  0x25   : > { %240 = vmatpush.msra.mxu0 %v219_v8 }
  0x27   : > { %241 = vmatpush.msra.mxu0 %v218_v9 }
  0x29   : > { %242 = vmatpush.msra.mxu0 %v217_v10 }
  0x2b   : > { %243 = vmatpush.msra.mxu0 %v216_v11 }
  0x2d   : > { %244 = vmatpush.msra.mxu0 %v215_v12 }
  0x2f   : > { %245 = vmatpush.msra.mxu0 %v214_v13 }
  0x31   : > { %246 = vmatpush.msra.mxu0 %v213_v14 }
  0x33   : > { %247 = vmatpush.msra.mxu0 %v212_v15 }
  0x34   : > { %248 = vmatmul.f32.vlgmr.msra.gmra.mxu0 %v211_v16 }
  0xb1   : > { %v249_v18 = vpop.f32.mrf.mxu0 }
  0xb2   : > { %v250_v19 = vadd.f32 %v435_v17, %v249_v18 }
  0xb4   : > { %436 = vtanh.f32 %v250_v19 }
  0xba   : > { %v437_v20 = vpop.eup %436 }
  0xbb   : > { %254 = vst.msk [vmem:[%s199_s10] sm:$0xff] %vm253_vm0, %v437_v20 }
  0xbc   : > { %465 = shalt.err (!%p462_p5)
}
  0xbd   : > { %380 = dma.vmem_to_hbm [thread:$0]  (%p578_p4), %s270_s11, 128, %s272_s18, %s256_s19  }
  0xbe PF: > { %p386_p6 = scmp.ge.s32.totalorder %s516_s17, 2  ;;  %s283_s29 = sand.u32 1, %s496_s12  }
  0xbf   : > { %s284_s4 = scalar_lea.sflag [#allocation3], %s283_s29 }
  0xc0   : > { %p383_p7 = pnand %p386_p6, %p585_p8 }
  0xc2   : > { %p384_p9 = pneg %p383_p7 }
  0xc4   : > { %491 = dma.done.wait (%p384_p9), %s284_s4, 128  }
  0xc5   : > { %493 = vsyncadd (%p384_p9), %s284_s4, 4294967168  ;;  %s16_s17 = sadd.s32 1, %s516_s17   ;;  %s692_s12 = smov %s500_s13 }
  0xc6   : > { %p13_p10 = scmp.ge.s32.totalorder %s16_s17, 4   ;;  %s693_s13 = smov %s504_s14 }
  0xc7   : > { %s694_s14 = smov %s591_s25  ;;  %s695_s15 = smov %s512_s16 }
  0xc8   : > { %s696_s16 = smov %s698_s20  ;;  %15 = sbr.rel (!%p13_p10) target bundleno = 4 (0x4), region = 73 }
  0xcd   :  { %290 = vsyncpa [#allocation3], 1 }
  0xce   :  { %292 = vsyncpa [#allocation3 + $0x1], 1 }

</bundles_post_ra>
